<compile_context>
chip_gen: v7x
topology: tpu7x:2x2x1
jax: 0.10.0
libtpu: 0.0.40
codegen_flags: <defaults>
</compile_context>

<pallas_src>
import jax
import jax.numpy as jnp
from jax.experimental import pallas as pl
from jax.experimental.pallas import tpu as pltpu


def _round_up(x, m):
    return ((x + m - 1) // m) * m


def _pick_tm(n_rows, d_lane, itemsize, sub):
    """Row-tile size.

    Big enough to amortize the ~0.35us per-grid-step overhead and sit past the
    HBM-roofline knee (~2 MiB per stream per pipeline buffer), small enough
    that 3 streams x 2 buffers stay far below every generation's scoped-VMEM
    limit.  For tiny inputs a single full-array block is used.
    """
    if n_rows <= sub:
        return max(int(n_rows), 1)           # full-array block (exact dims)
    budget_rows = (2 * 1024 * 1024) // max(d_lane * itemsize, 1)
    tm = max(sub, min(budget_rows, 4096))
    # Keep >= 2 grid steps when possible so a "parallel" row axis can be
    # split across both v7x TensorCores.
    half = _round_up((n_rows + 1) // 2, sub)
    tm = min(tm, half, _round_up(n_rows, sub))
    return max(sub, (tm // sub) * sub)


def _fusion_kernel(row_ref, col_ref, w_ref, b_ref, out_ref):
    """Generic path: full hidden dim D on the lane axis (D >= 128 or odd D).

    Per-row logits are plain f32 VPU multiply + cross-lane sum (exact)."""
    row = row_ref[...].astype(jnp.float32)                    # (tm, D)
    col = col_ref[...].astype(jnp.float32)
    w1 = w_ref[0:1, :]                                        # (1, D) f32
    w2 = w_ref[1:2, :]
    logit_a = jnp.sum(row * w1, axis=-1, keepdims=True) + b_ref[0]
    logit_b = jnp.sum(col * w2, axis=-1, keepdims=True) + b_ref[1]
    alpha = jax.nn.sigmoid(logit_a)                           # (tm, 1)
    beta = jax.nn.sigmoid(logit_b)
    gate = alpha / (alpha + beta)                             # exact divide
    out_ref[...] = (col + gate * (row - col)).astype(out_ref.dtype)


def _fusion_kernel_packed(row_ref, col_ref, wseg_ref, b_ref, out_ref):
    """Lane-dense path for D < 128: pack = 128 // D logical rows per lane row.

    wseg[k] = diag(tile(w_k, pack)) masked to block-diagonal segments, so
    `row @ wseg[0]` places, in every lane of a D-wide segment, that logical
    row's <w1, x> dot product (already broadcast across its segment).
    Operands are cast to bf16 for the MXU (f32 accumulation) so the packed
    path stays memory-bound on v5e/v6e/v7x."""
    row_raw = row_ref[...]                                    # (tm, 128)
    col_raw = col_ref[...]
    row = row_raw.astype(jnp.float32)
    col = col_raw.astype(jnp.float32)
    logit_a = jnp.dot(row_raw.astype(jnp.bfloat16), wseg_ref[0],
                      preferred_element_type=jnp.float32) + b_ref[0]
    logit_b = jnp.dot(col_raw.astype(jnp.bfloat16), wseg_ref[1],
                      preferred_element_type=jnp.float32) + b_ref[1]
    alpha = jax.nn.sigmoid(logit_a)                           # (tm, 128)
    beta = jax.nn.sigmoid(logit_b)
    gate = alpha / (alpha + beta)                             # exact divide
    out_ref[...] = (col + gate * (row - col)).astype(out_ref.dtype)


def adaptive_fusion(rowg_rep, colg_rep, w1, b1, w2, b2, *, tm=None):
    """rowg_rep, colg_rep: (..., D). w1, w2: (D,). b1, b2: scalars."""
    orig_shape = rowg_rep.shape
    D = int(orig_shape[-1])
    out_dtype = rowg_rep.dtype
    itemsize = out_dtype.itemsize
    sub = 8 * max(1, 4 // itemsize)          # 8 for f32, 16 for bf16, 32 for i8

    row2d = rowg_rep.reshape(-1, D)
    col2d = colg_rep.reshape(-1, D)
    M = row2d.shape[0]

    w1f = jnp.asarray(w1, jnp.float32).reshape(D)
    w2f = jnp.asarray(w2, jnp.float32).reshape(D)
    bias = jnp.stack([jnp.asarray(b1, jnp.float32).reshape(()),
                      jnp.asarray(b2, jnp.float32).reshape(())])   # (2,) -> SMEM

    packed = (D < 128) and (128 % D == 0)
    if packed:
        pack = 128 // D
        d_lane = 128
        m_pad = _round_up(max(M, 1), pack)   # at most pack-1 rows; usually none
        n_rows = m_pad // pack
    else:
        pack = 1
        d_lane = D
        m_pad = M
        n_rows = M

    if tm is None:
        tm = _pick_tm(n_rows, d_lane, itemsize, sub)
    else:
        tm = max(1, min(int(tm), _round_up(n_rows, sub)))
        if tm < n_rows:
            tm = max(sub, (tm // sub) * sub)

    # Accurate VMEM footprint: 3 row-streams, double-buffered, + constants
    # (bf16 wseg is 64 KiB; generic w is 8*D bytes).  Keep the requested limit
    # between 16 MiB (raises v5e's small default) and 48 MiB (headroom under
    # v7x's 64 MiB physical VMEM for Mosaic internal scratch).
    tile_bytes = tm * d_lane * itemsize
    const_bytes = (2 * 128 * 128 * 2) if packed else (2 * D * 4)
    footprint = 3 * 2 * tile_bytes + 2 * const_bytes + (1 << 14)
    vmem_limit = int(min(48 * 1024 * 1024, max(16 * 1024 * 1024, 2 * footprint)))
    cparams = pltpu.CompilerParams(
        dimension_semantics=("parallel",),
        vmem_limit_bytes=vmem_limit)

    if packed:
        if m_pad != M:
            # Rare case (M % pack != 0): pad only a handful of rows.
            row2d = jnp.pad(row2d, ((0, m_pad - M), (0, 0)))
            col2d = jnp.pad(col2d, ((0, m_pad - M), (0, 0)))
        rows_p = row2d.reshape(n_rows, pack * D)               # (n_rows, 128)
        cols_p = col2d.reshape(n_rows, pack * D)
        lane = jnp.arange(128, dtype=jnp.int32)
        segmat = lane[:, None] // D == lane[None, :] // D      # (128, 128) bool
        wseg = jnp.stack(
            [jnp.where(segmat, jnp.tile(w1f, pack)[:, None], 0.0),
             jnp.where(segmat, jnp.tile(w2f, pack)[:, None], 0.0)]
        ).astype(jnp.bfloat16)                                  # (2, 128, 128)

        grid = (pl.cdiv(n_rows, tm),)
        out = pl.pallas_call(
            _fusion_kernel_packed,
            out_shape=jax.ShapeDtypeStruct((n_rows, 128), out_dtype),
            grid_spec=pltpu.PrefetchScalarGridSpec(
                num_scalar_prefetch=0,
                grid=grid,
                in_specs=[
                    pl.BlockSpec((tm, 128), lambda i: (i, 0)),          # row
                    pl.BlockSpec((tm, 128), lambda i: (i, 0)),          # col
                    # Constant block index -> Pallas revisit: DMA'd once.
                    pl.BlockSpec((2, 128, 128), lambda i: (0, 0, 0)),   # wseg
                    pl.BlockSpec(memory_space=pltpu.MemorySpace.SMEM),  # bias
                ],
                out_specs=pl.BlockSpec((tm, 128), lambda i: (i, 0)),
            ),
            compiler_params=cparams,
        )(rows_p, cols_p, wseg, bias)
        out = out.reshape(m_pad, D)
        if m_pad != M:
            out = out[:M]
    else:
        w_arr = jnp.stack([w1f, w2f])                           # (2, D) f32
        grid = (pl.cdiv(M, tm),)
        out = pl.pallas_call(
            _fusion_kernel,
            out_shape=jax.ShapeDtypeStruct((M, D), out_dtype),
            grid_spec=pltpu.PrefetchScalarGridSpec(
                num_scalar_prefetch=0,
                grid=grid,
                in_specs=[
                    pl.BlockSpec((tm, D), lambda i: (i, 0)),            # row
                    pl.BlockSpec((tm, D), lambda i: (i, 0)),            # col
                    pl.BlockSpec((2, D), lambda i: (0, 0)),             # w1/w2
                    pl.BlockSpec(memory_space=pltpu.MemorySpace.SMEM),  # bias
                ],
                out_specs=pl.BlockSpec((tm, D), lambda i: (i, 0)),
            ),
            compiler_params=cparams,
        )(row2d, col2d, w_arr, bias)

    return out.reshape(orig_shape)


def adaptive_fusion_ref(rowg_rep, colg_rep, w1, b1, w2, b2):
    alpha = jax.nn.sigmoid(jnp.sum(rowg_rep * w1, axis=-1, keepdims=True) + b1)
    beta = jax.nn.sigmoid(jnp.sum(colg_rep * w2, axis=-1, keepdims=True) + b2)
    alpha = alpha / (alpha + beta)
    beta = 1.0 - alpha
    return alpha * rowg_rep + beta * colg_rep


if __name__ == "__main__":
    batch, seq = 2, 8
    # hidden=32 exercises the lane-dense packed path (bf16 MXU logits, so the
    # tolerance is the bf16-gate bound ~4e-3 with margin); hidden=300 (the
    # module's default input_dim) exercises the generic f32 VPU path (tight).
    for hidden, tol in ((32, 1e-2), (300, 1e-4)):
        key = jax.random.PRNGKey(0)
        k_row, k_col, k_w1, k_b1, k_w2, k_b2 = jax.random.split(key, 6)

        rowg_rep = jax.random.normal(k_row, (batch, seq, hidden), jnp.float32)
        colg_rep = jax.random.normal(k_col, (batch, seq, hidden), jnp.float32)

        bound = 1.0 / (hidden ** 0.5)
        w1 = jax.random.uniform(k_w1, (hidden,), jnp.float32, -bound, bound)
        b1 = jax.random.uniform(k_b1, (), jnp.float32, -bound, bound)
        w2 = jax.random.uniform(k_w2, (hidden,), jnp.float32, -bound, bound)
        b2 = jax.random.uniform(k_b2, (), jnp.float32, -bound, bound)

        out = adaptive_fusion(rowg_rep, colg_rep, w1, b1, w2, b2)
        out = jax.block_until_ready(out)

        ref = adaptive_fusion_ref(rowg_rep, colg_rep, w1, b1, w2, b2)
        assert out.shape == rowg_rep.shape
        err = float(jnp.max(jnp.abs(out - ref)))
        assert err < tol, (hidden, err)

    print("KERNEL_OK")
</pallas_src>

<mosaic_0001>
module attributes {stable_mosaic.version = 11 : i64} {
  func.func @_fusion_kernel_packed(%arg0: i32, %arg1: memref<4x128xf32, #tpu.memory_space<vmem>>, %arg2: memref<4x128xf32, #tpu.memory_space<vmem>>, %arg3: memref<2x128x128xbf16, #tpu.memory_space<vmem>>, %arg4: memref<2xf32, #tpu.memory_space<smem>>, %arg5: memref<4x128xf32, #tpu.memory_space<vmem>>) attributes {dimension_semantics = [#tpu.dimension_semantics<parallel>], iteration_bounds = array<i64: 1>, scalar_prefetch = 0 : i64, scratch_operands = 0 : i64, tpu.core_type = #tpu.core_type<tc>, window_params = [{transform_indices = @transform_0, window_bounds = array<i64: 4, 128>}, {transform_indices = @transform_1, window_bounds = array<i64: 4, 128>}, {pipeline_mode = #tpu.pipeline_mode<synchronous>, transform_indices = @transform_2, window_bounds = array<i64: 2, 128, 128>}, {transform_indices = @transform_3, window_bounds = array<i64: 2>}, {transform_indices = @transform_4, window_bounds = array<i64: 4, 128>}]} {
    %c0 = arith.constant 0 : index
    %c0_0 = arith.constant 0 : index
    %0 = vector.load %arg1[%c0, %c0_0] : memref<4x128xf32, #tpu.memory_space<vmem>>, vector<4x128xf32>
    %c0_1 = arith.constant 0 : index
    %c0_2 = arith.constant 0 : index
    %1 = vector.load %arg2[%c0_1, %c0_2] : memref<4x128xf32, #tpu.memory_space<vmem>>, vector<4x128xf32>
    %2 = arith.truncf %0 : vector<4x128xf32> to vector<4x128xbf16>
    %c0_3 = arith.constant 0 : index
    %c0_4 = arith.constant 0 : index
    %c0_5 = arith.constant 0 : index
    %3 = vector.load %arg3[%c0_3, %c0_4, %c0_5] : memref<2x128x128xbf16, #tpu.memory_space<vmem>>, vector<1x128x128xbf16>
    %4 = vector.shape_cast %3 : vector<1x128x128xbf16> to vector<128x128xbf16>
    %cst = arith.constant dense<0.000000e+00> : vector<4x128xf32>
    %5 = tpu.matmul %2, %4, %cst {dimension_numbers = #tpu.dot_dimension_numbers<[1], [0], [0], [1], [0, 0, 1, 1], [], []>} : vector<4x128xbf16>, vector<128x128xbf16>, vector<4x128xf32> -> vector<4x128xf32>
    %c0_6 = arith.constant 0 : index
    %6 = memref.load %arg4[%c0_6] : memref<2xf32, #tpu.memory_space<smem>>
    %7 = vector.broadcast %6 : f32 to vector<4x128xf32>
    %8 = arith.addf %5, %7 : vector<4x128xf32>
    %9 = arith.truncf %1 : vector<4x128xf32> to vector<4x128xbf16>
    %c1 = arith.constant 1 : index
    %c0_7 = arith.constant 0 : index
    %c0_8 = arith.constant 0 : index
    %10 = vector.load %arg3[%c1, %c0_7, %c0_8] : memref<2x128x128xbf16, #tpu.memory_space<vmem>>, vector<1x128x128xbf16>
    %11 = vector.shape_cast %10 : vector<1x128x128xbf16> to vector<128x128xbf16>
    %cst_9 = arith.constant dense<0.000000e+00> : vector<4x128xf32>
    %12 = tpu.matmul %9, %11, %cst_9 {dimension_numbers = #tpu.dot_dimension_numbers<[1], [0], [0], [1], [0, 0, 1, 1], [], []>} : vector<4x128xbf16>, vector<128x128xbf16>, vector<4x128xf32> -> vector<4x128xf32>
    %c1_10 = arith.constant 1 : index
    %13 = memref.load %arg4[%c1_10] : memref<2xf32, #tpu.memory_space<smem>>
    %14 = vector.broadcast %13 : f32 to vector<4x128xf32>
    %15 = arith.addf %12, %14 : vector<4x128xf32>
    %16 = arith.negf %8 : vector<4x128xf32>
    %17 = math.exp %16 : vector<4x128xf32>
    %cst_11 = arith.constant 1.000000e+00 : f32
    %18 = vector.broadcast %cst_11 : f32 to vector<4x128xf32>
    %19 = arith.addf %18, %17 : vector<4x128xf32>
    %20 = arith.divf %18, %19 : vector<4x128xf32>
    %21 = arith.negf %15 : vector<4x128xf32>
    %22 = math.exp %21 : vector<4x128xf32>
    %cst_12 = arith.constant 1.000000e+00 : f32
    %23 = vector.broadcast %cst_12 : f32 to vector<4x128xf32>
    %24 = arith.addf %23, %22 : vector<4x128xf32>
    %25 = arith.divf %23, %24 : vector<4x128xf32>
    %26 = arith.addf %20, %25 : vector<4x128xf32>
    %27 = arith.divf %20, %26 : vector<4x128xf32>
    %28 = arith.subf %0, %1 : vector<4x128xf32>
    %29 = arith.mulf %27, %28 : vector<4x128xf32>
    %30 = arith.addf %1, %29 : vector<4x128xf32>
    %c0_13 = arith.constant 0 : index
    %c0_14 = arith.constant 0 : index
    %31 = vector.load %arg5[%c0_13, %c0_14] : memref<4x128xf32, #tpu.memory_space<vmem>>, vector<4x128xf32>
    tpu.vector_store %arg5[%c0_13, %c0_14], %30 {strides = array<i32>} : memref<4x128xf32, #tpu.memory_space<vmem>>, vector<4x128xf32>,
    return
  }
  func.func @transform_0(%arg0: i32) -> (i32, i32) {
    %c0_i32 = arith.constant 0 : i32
    %c0_i32_0 = arith.constant 0 : i32
    return %arg0, %c0_i32 : i32, i32
  }
  func.func @transform_1(%arg0: i32) -> (i32, i32) {
    %c0_i32 = arith.constant 0 : i32
    %c0_i32_0 = arith.constant 0 : i32
    return %arg0, %c0_i32 : i32, i32
  }
  func.func @transform_2(%arg0: i32) -> (i32, i32, i32) {
    %c0_i32 = arith.constant 0 : i32
    %c0_i32_0 = arith.constant 0 : i32
    %c0_i32_1 = arith.constant 0 : i32
    %c0_i32_2 = arith.constant 0 : i32
    return %c0_i32, %c0_i32_0, %c0_i32_1 : i32, i32, i32
  }
  func.func @transform_3(%arg0: i32) -> i32 {
    %c0_i32 = arith.constant 0 : i32
    %c0_i32_0 = arith.constant 0 : i32
    return %c0_i32 : i32
  }
  func.func @transform_4(%arg0: i32) -> (i32, i32) {
    %c0_i32 = arith.constant 0 : i32
    %c0_i32_0 = arith.constant 0 : i32
    return %arg0, %c0_i32 : i32, i32
  }
}

</mosaic_0001>

<bundles_post_ra>
// kernel: tpu_custom_call.1
= control target key start
LH: loop header
LB: loop body
LE: loop exit
PB: predicated region body
PF: predicated region fallthrough
CT: control target
= control target key end

     0   :  { %9 = vsyncpa [#allocation3], 0  ;;  %s627_s0 = inlined_call_operand.hbm [shape: f32[4,128], index: 0, kind: input, shape index: {}]   ;;  %s628_s1 = inlined_call_operand.hbm [shape: f32[4,128], index: 1, kind: input, shape index: {}]   ;;  %s629_s2 = inlined_call_operand.hbm [shape: bf16[2,128,128], index: 2, kind: input, shape index: {}]   ;;  %s630_s3 = inlined_call_operand.vmem [shape: f32[2], index: 3, kind: input, shape index: {}]   ;;  %s631_s4 = inlined_call_operand.hbm [shape: f32[4,128], index: 4, kind: output, shape index: {}]  }
   0x1   :  { %10 = vsyncpa [#allocation7], 0 }
   0x2   :  { %11 = vsyncpa [#allocation5], 0 }
   0x3   :  { %12 = vsyncpa [#allocation4], 0  ;;  %s542_s15 = smov [#allocation6]   ;;  %s543_s17 = smov [#allocation2]  }
   0x4   :  { %s29_s16 = sshll.u32 %s542_s15, 4  ;;  %s19_s18 = sshll.u32 %s543_s17, 4  ;;  %s30_s16 = int_to_ptr.vmem [resolvable:$true] %s29_s16  ;;  %s20_s18 = int_to_ptr.vmem [resolvable:$true] %s19_s18 }
   0x5   :  { %s434_s21 = scalar_lea.hbm %s628_s1, 64 }
   0x6   :  { %p435_p0 = scmp.ne.s32.totalorder %s628_s1, %s434_s21  ;;  %p438_p1 = scmp.lt.u32.totalorder %s434_s21, %s628_s1 }
   0x8   :  { %p440_p2 = pnand %p438_p1, %p435_p0 }
   0xa   :  { %443 = shalt.err (!%p440_p2)
}
   0xb   :  { %s444_s26 = scalar_lea.vmem %s30_s16, 64  ;;  %p449_p4 = scmp.lt.s32.totalorder %s30_s16, %s30_s16 }
   0xc   :  { %p445_p3 = scmp.ne.s32.totalorder %s30_s16, %s444_s26  ;;  %p450_p5 = scmp.lt.s32.totalorder %s444_s26, %s444_s26 }
   0xe   :  { %p451_p6 = por %p450_p5, %p449_p4 }
  0x10   :  { %p452_p7 = pnand %p451_p6, %p445_p3 }
  0x12   :  { %455 = shalt.err (!%p452_p7)
}
  0x13   :  { %32 = dma.hbm_to_vmem [thread:$0]  %s628_s1, 64, %s30_s16, [#allocation7]  }
  0x14   :  { %s456_s5 = scalar_lea.hbm %s627_s0, 64 }
  0x15   :  { %p457_p8 = scmp.ne.s32.totalorder %s627_s0, %s456_s5  ;;  %p460_p9 = scmp.lt.u32.totalorder %s456_s5, %s627_s0 }
  0x17   :  { %p462_p10 = pnand %p460_p9, %p457_p8 }
  0x19   :  { %465 = shalt.err (!%p462_p10)
}
  0x1a   :  { %s466_s10 = scalar_lea.vmem %s20_s18, 64  ;;  %p471_p12 = scmp.lt.s32.totalorder %s20_s18, %s20_s18 }
  0x1b   :  { %p467_p11 = scmp.ne.s32.totalorder %s20_s18, %s466_s10  ;;  %p472_p13 = scmp.lt.s32.totalorder %s466_s10, %s466_s10 }
  0x1d   :  { %p473_p0 = por %p472_p13, %p471_p12 }
  0x1f   :  { %p474_p1 = pnand %p473_p0, %p467_p11 }
  0x21   :  { %477 = shalt.err (!%p474_p1)
}
  0x22   :  { %22 = dma.hbm_to_vmem [thread:$0]  %s627_s0, 64, %s20_s18, [#allocation3]  }
  0x23   :  { %s544_s12 = smov [#allocation8]   ;;  %s51_s16 = sshll.u32 %s630_s3, 4  ;;  %s52_s16 = int_to_ptr.vmem [resolvable:$true] %s51_s16 }
  0x24   :  { %s38_s13 = sshll.u32 %s544_s12, 4  ;;  %s478_s20 = scalar_lea.hbm %s629_s2, 2048  ;;  %s39_s13 = int_to_ptr.vmem [resolvable:$true] %s38_s13 }
  0x25   :  { %p479_p2 = scmp.ne.s32.totalorder %s629_s2, %s478_s20  ;;  %p482_p3 = scmp.lt.u32.totalorder %s478_s20, %s629_s2 }
  0x27   :  { %p484_p4 = pnand %p482_p3, %p479_p2 }
  0x29   :  { %487 = shalt.err (!%p484_p4)
}
  0x2a   :  { %s488_s0 = scalar_lea.vmem %s39_s13, 2048  ;;  %p493_p6 = scmp.lt.s32.totalorder %s39_s13, %s39_s13 }
  0x2b   :  { %p489_p5 = scmp.ne.s32.totalorder %s39_s13, %s488_s0  ;;  %p494_p7 = scmp.lt.s32.totalorder %s488_s0, %s488_s0 }
  0x2d   :  { %p495_p8 = por %p494_p7, %p493_p6 }
  0x2f   :  { %p496_p9 = pnand %p495_p8, %p489_p5 }
  0x31   :  { %499 = shalt.err (!%p496_p9)
}
  0x32   :  { %s545_s3 = smov 64   ;;  %s546_s18 = smov 4  }
  0x33   :  { %44 = dma.hbm_to_vmem [thread:$0]  %s629_s2, 2048, %s39_s13, [#allocation7], %s545_s3, %s545_s3, %s546_s18  }
  0x34   :  { %s500_s27 = scalar_lea.vmem %s52_s16, 16  ;;  %p505_p11 = scmp.lt.s32.totalorder %s52_s16, %s52_s16 }
  0x35   :  { %p501_p10 = scmp.ne.s32.totalorder %s52_s16, %s500_s27  ;;  %p506_p12 = scmp.lt.s32.totalorder %s500_s27, %s500_s27 }
  0x37   :  { %p507_p13 = por %p506_p12, %p505_p11 }
  0x39   :  { %p508_p0 = pnand %p507_p13, %p501_p10 }
  0x3b   :  { %511 = shalt.err (!%p508_p0)
}
  0x3c   :  { %s547_s28 = smov [#allocation9]  }
  0x3d   :  { %54 = dma.vmem_to_smem %s52_s16, 16, %s547_s28, [#allocation5]  }
  0x3e   :  { %534 = dma.done.wait [#allocation3], 64  }
  0x3f   :  { %535 = vsyncadd [#allocation3], 4294967232 }
  0x40   :  { %536 = dma.done.wait [#allocation7], 2112  }
  0x41   :  { %537 = vsyncadd [#allocation7], 4294965184 }
  0x42   :  { %538 = dma.done.wait [#allocation5], 16  }
  0x43   :  { %539 = vsyncadd [#allocation5], 4294967280 }
  0x44   :  { %67 = sfence }
  0x45   :  { %v408_v0 = vld [vmem:[#allocation8] sm:$0xff]   ;;  %v548_v1 = vmov 0.0   ;;  %v410_v3 = vld [vmem:[#allocation8 + $0x8] sm:$0xff]   ;;  %vm549_vm0 = vmmov 0   ;;  %v412_v5 = vld [vmem:[#allocation8 + $0x10] sm:$0xff]   ;;  %s88_s2 = sld [smem:[#allocation9]] }
  0x46   :  { %359 = vmatprep.subr.bf16.mxu0 %v548_v1  ;;  %379 = vmatprep.subr.bf16.mxu1 %v548_v1  ;;  %v409_v2 = vld [vmem:[#allocation8 + $0x40] sm:$0xff]   ;;  %v411_v4 = vld [vmem:[#allocation8 + $0x48] sm:$0xff]   ;;  %v413_v6 = vld [vmem:[#allocation8 + $0x50] sm:$0xff]   ;;  %s330_s29 = sld [smem:[#allocation9 + $0x1]]  ;;  %s550_s30 = smov [#allocation10]  }
  0x47   :  { %360 = vmatpush3.bf16.msra.mxu0 %v408_v0  ;;  %375 = vmatprep.mubr.msk.bf16.mxu0 %vm549_vm0, %v548_v1  ;;  %v414_v7 = vld [vmem:[#allocation8 + $0x18] sm:$0xff]   ;;  %v416_v9 = vld [vmem:[#allocation8 + $0x20] sm:$0xff]   ;;  %v418_v11 = vld [vmem:[#allocation8 + $0x28] sm:$0xff]   ;;  %s311_s5 = sshll.u32 %s550_s30, 4  ;;  %s312_s5 = int_to_ptr.vmem [resolvable:$true] %s311_s5 }
  0x48   :  { %380 = vmatpush3.bf16.msra.mxu1 %v409_v2  ;;  %361 = vmatprep.subr.bf16.mxu0 %v548_v1  ;;  %v415_v8 = vld [vmem:[#allocation8 + $0x58] sm:$0xff]   ;;  %v417_v10 = vld [vmem:[#allocation8 + $0x60] sm:$0xff]   ;;  %v419_v12 = vld [vmem:[#allocation8 + $0x68] sm:$0xff]   ;;  %s512_s6 = scalar_lea.vmem %s312_s5, 64  ;;  %p517_p2 = scmp.lt.s32.totalorder %s312_s5, %s312_s5 }
  0x49   :  { %381 = vmatprep.subr.bf16.mxu1 %v548_v1  ;;  %395 = vmatprep.mubr.msk.bf16.mxu1 %vm549_vm0, %v548_v1  ;;  %v420_v13 = vld [vmem:[#allocation8 + $0x30] sm:$0xff]   ;;  %v422_v15 = vld [vmem:[#allocation8 + $0x38] sm:$0xff]   ;;  %p513_p1 = scmp.ne.s32.totalorder %s312_s5, %s512_s6  ;;  %p518_p3 = scmp.lt.s32.totalorder %s512_s6, %s512_s6 }
  0x4a   :  { %v421_v14 = vld [vmem:[#allocation8 + $0x70] sm:$0xff]   ;;  %v69_v16 = vld [vmem:[#allocation2] sm:$0xf]  ;;  %v70_v18 = vld [vmem:[#allocation6] sm:$0xf] }
  0x4b   :  { %362 = vmatpush3.bf16.msra.mxu0 %v410_v3  ;;  %v423_v17 = vld [vmem:[#allocation8 + $0x78] sm:$0xff]   ;;  %v71_v19 = vpack.c.bf16 %v69_v16, %v69_v16  ;;  %v178_v20 = vpack.c.bf16 %v70_v18, %v70_v18  ;;  %v89_v21 = vstv %s88_s2  ;;  %v301_v42 = vsub.f32 %v69_v16, %v70_v18  ;;  %p519_p4 = por %p518_p3, %p517_p2 }
  0x4c   :  { %382 = vmatpush3.bf16.msra.mxu1 %v411_v4  ;;  %363 = vmatprep.subr.bf16.mxu0 %v548_v1  ;;  %v197_v22 = vstv %s330_s29 }
  0x4d   :  { %383 = vmatprep.subr.bf16.mxu1 %v548_v1  ;;  %p520_p5 = pnand %p519_p4, %p513_p1 }
  0x4f   :  { %364 = vmatpush3.bf16.msra.mxu0 %v412_v5 }
  0x50   :  { %384 = vmatpush3.bf16.msra.mxu1 %v413_v6  ;;  %365 = vmatprep.subr.bf16.mxu0 %v548_v1 }
  0x51   :  { %385 = vmatprep.subr.bf16.mxu1 %v548_v1 }
  0x53   :  { %366 = vmatpush3.bf16.msra.mxu0 %v414_v7 }
  0x54   :  { %386 = vmatpush3.bf16.msra.mxu1 %v415_v8  ;;  %367 = vmatprep.subr.bf16.mxu0 %v548_v1 }
  0x55   :  { %387 = vmatprep.subr.bf16.mxu1 %v548_v1 }
  0x57   :  { %368 = vmatpush3.bf16.msra.mxu0 %v416_v9 }
  0x58   :  { %388 = vmatpush3.bf16.msra.mxu1 %v417_v10  ;;  %369 = vmatprep.subr.bf16.mxu0 %v548_v1 }
  0x59   :  { %389 = vmatprep.subr.bf16.mxu1 %v548_v1 }
  0x5b   :  { %370 = vmatpush3.bf16.msra.mxu0 %v418_v11 }
  0x5c   :  { %390 = vmatpush3.bf16.msra.mxu1 %v419_v12  ;;  %371 = vmatprep.subr.bf16.mxu0 %v548_v1 }
  0x5d   :  { %391 = vmatprep.subr.bf16.mxu1 %v548_v1 }
  0x5f   :  { %372 = vmatpush3.bf16.msra.mxu0 %v420_v13 }
  0x60   :  { %392 = vmatpush3.bf16.msra.mxu1 %v421_v14  ;;  %373 = vmatprep.subr.bf16.mxu0 %v548_v1 }
  0x61   :  { %393 = vmatprep.subr.bf16.mxu1 %v548_v1 }
  0x63   :  { %374 = vmatpush3.bf16.msra.mxu0 %v422_v15 }
  0x64   :  { %394 = vmatpush3.bf16.msra.mxu1 %v423_v17 }
  0x66   :  { %376 = vmatmul.mubr.bf16.vlgmr.msra.gmra.mrb[0].mxu0 %v71_v19 }
  0x67   :  { %396 = vmatmul.mubr.bf16.vlgmr.msra.gmra.mrb[0].mxu1 %v178_v20 }
 0x139   :  { %v172_v23 = vpop.f32.mrb[0].mxu0 }
 0x13a   :  { %v173_v24 = vadd.f32 %v172_v23, %v89_v21  ;;  %v280_v25 = vpop.f32.mrb[0].mxu1  ;;  %v377_v26 = vpop.f32.mrb[1].mxu0 }
 0x13b   :  { %v281_v27 = vadd.f32 %v280_v25, %v197_v22  ;;  %v397_v28 = vpop.f32.mrb[1].mxu1  ;;  %v175_v29 = vpop.f32.mrb[2].mxu0 }
 0x13c   :  { %v339_v30 = vmul.f32 -1.442695, %v173_v24  ;;  %v283_v31 = vpop.f32.mrb[2].mxu1  ;;  %v378_v32 = vpop.f32.mrb[3].mxu0 }
 0x13d   :  { %v340_v33 = vmul.f32 -1.442695, %v281_v27  ;;  %v398_v34 = vpop.f32.mrb[3].mxu1 }
 0x13e   :  { %424 = vpow2.f32 %v339_v30 }
 0x13f   :  { %426 = vpow2.f32 %v340_v33 }
 0x148   :  { %v425_v35 = vpop.eup %424 }
 0x149   :  { %v427_v36 = vpop.eup %426  ;;  %v289_v37 = vadd.f32 1.0, %v425_v35 }
 0x14a   :  { %v295_v38 = vadd.f32 1.0, %v427_v36 }
 0x14b   :  { %428 = vrcp.f32 %v289_v37 }
 0x14c   :  { %430 = vrcp.f32 %v295_v38 }
 0x155   :  { %v429_v39 = vpop.eup %428 }
 0x156   :  { %v431_v40 = vpop.eup %430 }
 0x157   :  { %v298_v41 = vadd.f32 %v431_v40, %v429_v39 }
 0x159   :  { %432 = vrcp.f32 %v298_v41 }
 0x163   :  { %v433_v43 = vpop.eup %432 }
 0x164   :  { %v300_v44 = vmul.f32 %v433_v43, %v429_v39 }
 0x166   :  { %v302_v45 = vmul.f32 %v301_v42, %v300_v44 }
 0x168   :  { %v303_v46 = vadd.f32 %v302_v45, %v70_v18 }
 0x16a   :  { %304 = vst [vmem:[#allocation10] sm:$0xf] %v303_v46 }
 0x16b   :  { %523 = shalt.err (!%p520_p5)
}
 0x16c   :  { %s524_s9 = scalar_lea.hbm %s631_s4, 64 }
 0x16d   :  { %p525_p6 = scmp.ne.s32.totalorder %s631_s4, %s524_s9  ;;  %p528_p7 = scmp.lt.u32.totalorder %s524_s9, %s631_s4 }
 0x16f   :  { %p530_p8 = pnand %p528_p7, %p525_p6 }
 0x171   :  { %533 = shalt.err (!%p530_p8)
}
 0x172   :  { %314 = dma.vmem_to_hbm [thread:$0]  %s312_s5, 64, %s631_s4, [#allocation4]  }
 0x173   :  { %540 = dma.done.wait [#allocation4], 64  }
 0x174   :  { %541 = vsyncadd [#allocation4], 4294967232 }
 0x175   :  { %318 = vsyncpa [#allocation3], 1 }
 0x176   :  { %319 = vsyncpa [#allocation7], 1 }
 0x177   :  { %320 = vsyncpa [#allocation4], 1 }
 0x178   :  { %321 = vsyncpa [#allocation5], 1 }

</bundles_post_ra>
